<compile_context>
chip_gen: v7x
topology: tpu7x:2x2x1
jax: 0.10.0
libtpu: 0.0.40
codegen_flags: <defaults>
</compile_context>

<pallas_src>
import jax
import jax.numpy as jnp
from jax.experimental import pallas as pl
from jax.experimental.pallas import tpu as pltpu


_XLA_FALLBACK_BYTES = 2 * 1024 * 1024   # below this, fused XLA max beats a kernel
_PIPELINE_BYTES = 2 * 1024 * 1024       # above this, force >=2 seq steps (DMA/compute overlap)
_MULTICORE_BYTES = 4 * 1024 * 1024      # above this, worth giving both v7x TCs work


def _tpu_generation_config():
    """(vmem_limit_bytes, tile_budget_bytes, tensorcores_per_chip), generation-aware.

    v5e / v6e: 128 MiB VMEM, 1 TensorCore   -> large budget, keep full-C contiguous DMAs.
    v7x      : 64 MiB VMEM per TC, 2 TCs    -> smaller budget, shard work across cores.
    Falls back to conservative values if the hardware query is unavailable.
    """
    try:
        vmem_bytes = int(getattr(pltpu.get_tpu_info(), "vmem_capacity_bytes", 0))
    except Exception:
        vmem_bytes = 0
    if vmem_bytes <= 0:
        return 32 << 20, 24 << 20, 1
    if vmem_bytes <= (96 << 20):          # v7x-class: 64 MiB per TensorCore, 2 TCs
        return 48 << 20, 32 << 20, 2
    return 96 << 20, 72 << 20, 1          # v5e / v6e: 128 MiB, single TensorCore


def _pick_tiles(batch_block, L, C, kernel_size, itemsize, tile_budget, min_seq_steps):
    """Pick (seq_tile, chan_tile) under the VMEM budget.

    seq_tile divides kernel_size and is a multiple of the packed sublane count
    (8 for f32, 16 for bf16, 32 for int8/fp8), or is the full sequence extent.
    chan_tile is a multiple of 128 dividing C (or full C when C is not
    128-aligned) so the output stays lane-dense.  When min_seq_steps > 1 we
    prefer the largest seq tile that still yields that many reduction steps so
    double-buffering can overlap the next tile's DMA with the current tile's
    VPU max.
    """
    sublane = {4: 8, 2: 16, 1: 32}.get(itemsize, 8)
    seq_cands = sorted(
        {t for t in range(sublane, kernel_size + 1, sublane) if kernel_size % t == 0},
        reverse=True,
    )
    if kernel_size == L and kernel_size not in seq_cands:
        seq_cands.insert(0, kernel_size)   # full-extent block is always legal
    if not seq_cands:
        # TODO(synk): kernel_size neither sublane-aligned nor equal to L would
        # need sequence padding; not needed for the module's fixed kernel_size.
        raise ValueError("Cannot tile the sequence axis cleanly.")

    if min_seq_steps > 1:
        multi = [t for t in seq_cands if kernel_size // t >= min_seq_steps]
        single = [t for t in seq_cands if kernel_size // t < min_seq_steps]
        seq_cands = multi + single

    if C % 128 == 0:
        c_cands = sorted({c for c in range(128, C + 1, 128) if C % c == 0}, reverse=True)
    else:
        c_cands = [C]   # full-extent channel block (still last / lane axis)

    for tl in seq_cands:
        for tc in c_cands:
            # double-buffered input block + one resident output accumulator
            need = 2 * batch_block * tl * tc * itemsize + batch_block * tc * itemsize
            if need <= tile_budget:
                return tl, tc
    raise ValueError("No tile configuration fits the VMEM budget.")


def _maxpool_single_kernel(x_ref, o_ref):
    # Whole pooling window resident: one sublane reduction, no init/accumulate.
    # x_ref: (bb, tl, tc); o_ref: (bb, tc)
    o_ref[...] = jnp.max(x_ref[...], axis=1)


def _maxpool_accum_kernel(x_ref, o_ref):
    # Multi-step sequence reduction: step 0 writes the tile max directly
    # (no -inf init pass), later steps accumulate with maximum.
    tile_max = jnp.max(x_ref[...], axis=1)
    s = pl.program_id(2)

    @pl.when(s == 0)
    def _():
        o_ref[...] = tile_max

    @pl.when(s != 0)
    def _():
        o_ref[...] = jnp.maximum(o_ref[...], tile_max)


def max_pooling_forward(x, kernel_size=1000, *, force_pallas=False, min_seq_steps=None):
    """Equivalent of MaxPooling.forward: permute(0,2,1) -> MaxPool1d(k) -> squeeze(-1).

    x: (B, L, C) with L // kernel_size == 1.  Returns (B, C) = max over
    x[:, :kernel_size, :].  `force_pallas` / `min_seq_steps` are test knobs.
    """
    B, L, C = x.shape
    assert L // kernel_size == 1, (
        "This kernel implements the module's intended case where the pooled "
        "output length is 1 (L // kernel_size == 1)."
    )
    itemsize = jnp.dtype(x.dtype).itemsize
    window_bytes = B * kernel_size * C * itemsize   # only the pooled window is streamed

    # Tiny inputs: pallas_call dispatch + per-step overhead (~0.35 us/step)
    # dominates and a standalone kernel forces an extra HBM materialization;
    # let XLA fuse the reduction instead.
    if not force_pallas and window_bytes < _XLA_FALLBACK_BYTES:
        return jnp.max(x[:, :kernel_size, :], axis=1)

    vmem_limit, tile_budget, num_tc = _tpu_generation_config()

    # v7x: give both TensorCores work by sharding the (parallel) batch axis.
    use_batch_grid = num_tc >= 2 and B >= 2 and window_bytes >= _MULTICORE_BYTES
    bb = 1 if use_batch_grid else B
    n_b = B if use_batch_grid else 1

    if min_seq_steps is None:
        # Ensure >= 2 reduction steps on non-trivial inputs so double-buffering
        # overlaps the next tile's DMA with the current tile's compute.
        min_seq_steps = 2 if window_bytes > _PIPELINE_BYTES else 1

    tl, tc = _pick_tiles(bb, L, C, kernel_size, itemsize, tile_budget, min_seq_steps)

    # v7x only: if neither the batch nor the channel axis provides a second
    # block, split channels so the second TensorCore is not idle (C stays
    # 128-aligned).  Never done on single-TC v5e/v6e (keeps DMAs contiguous).
    if (num_tc >= 2 and n_b == 1 and C // tc == 1 and C % 256 == 0
            and window_bytes >= _MULTICORE_BYTES):
        tc = C // 2

    n_seq = kernel_size // tl
    n_chan = C // tc
    kernel = _maxpool_single_kernel if n_seq == 1 else _maxpool_accum_kernel

    return pl.pallas_call(
        kernel,
        out_shape=jax.ShapeDtypeStruct((B, C), x.dtype),
        grid_spec=pltpu.PrefetchScalarGridSpec(
            num_scalar_prefetch=0,
            grid=(n_b, n_chan, n_seq),
            # seq stays second-to-last (sublane) and C last (lane): the
            # reduction is cheap VPU vmax across vregs, not a cross-lane XLU op.
            in_specs=[pl.BlockSpec((bb, tl, tc), lambda b, c, s: (b, s, c))],
            out_specs=pl.BlockSpec((bb, tc), lambda b, c, s: (b, c)),
        ),
        compiler_params=pltpu.CompilerParams(
            # batch & channels independent (megacore-shardable on v7x);
            # sequence is the reduction axis (output block constant across it).
            dimension_semantics=("parallel", "parallel", "arbitrary"),
            vmem_limit_bytes=vmem_limit,
        ),
    )(x)


if __name__ == "__main__":
    # Small-but-faithful shapes: the module hardcodes kernel_size=1000, so the
    # sequence length must be 1000 for the squeeze(-1) to yield (B, C).
    B, L, C = 2, 1000, 128
    key = jax.random.PRNGKey(0)
    x = jax.random.normal(key, (B, L, C), dtype=jnp.float32)

    # Pure-JAX reference of the PyTorch forward:
    # permute(0,2,1) -> MaxPool1d(1000) -> squeeze(-1)  ==  max over seq axis.
    ref = jnp.max(x[:, :1000, :], axis=1)

    # 1) Single-step Pallas path (whole pooling window resident in VMEM).
    out1 = jax.block_until_ready(max_pooling_forward(x, 1000, force_pallas=True))
    assert out1.shape == (B, C)
    assert jnp.allclose(out1, ref), "single-step kernel mismatch vs reference"

    # 2) Multi-step Pallas path (sequence-axis accumulator, exercises pl.when).
    out2 = jax.block_until_ready(
        max_pooling_forward(x, 1000, force_pallas=True, min_seq_steps=4))
    assert jnp.allclose(out2, ref), "multi-step kernel mismatch vs reference"

    # 3) Default dispatch: this input is ~1 MiB, so it takes the fused XLA path.
    out3 = jax.block_until_ready(max_pooling_forward(x, 1000))
    assert jnp.allclose(out3, ref), "dispatch path mismatch vs reference"

    print("KERNEL_OK")
</pallas_src>

<mosaic_0001>
module attributes {stable_mosaic.version = 11 : i64} {
  func.func @_maxpool_single_kernel(%arg0: i32, %arg1: i32, %arg2: i32, %arg3: memref<2x1000x128xf32, #tpu.memory_space<vmem>>, %arg4: memref<2x128xf32, #tpu.memory_space<vmem>>) attributes {dimension_semantics = [#tpu.dimension_semantics<parallel>, #tpu.dimension_semantics<parallel>, #tpu.dimension_semantics<arbitrary>], iteration_bounds = array<i64: 1, 1, 1>, scalar_prefetch = 0 : i64, scratch_operands = 0 : i64, tpu.core_type = #tpu.core_type<tc>, window_params = [{transform_indices = @transform_0, window_bounds = array<i64: 2, 1000, 128>}, {transform_indices = @transform_1, window_bounds = array<i64: 2, 128>}]} {
    %c0 = arith.constant 0 : index
    %c0_0 = arith.constant 0 : index
    %c0_1 = arith.constant 0 : index
    %0 = vector.load %arg3[%c0, %c0_0, %c0_1] : memref<2x1000x128xf32, #tpu.memory_space<vmem>>, vector<2x1000x128xf32>
    %cst = arith.constant dense<0xFF800000> : vector<2x128xf32>
    %1 = vector.multi_reduction <maximumf>, %0, %cst [1] : vector<2x1000x128xf32> to vector<2x128xf32>
    %c0_2 = arith.constant 0 : index
    %c0_3 = arith.constant 0 : index
    %2 = vector.load %arg4[%c0_2, %c0_3] : memref<2x128xf32, #tpu.memory_space<vmem>>, vector<2x128xf32>
    tpu.vector_store %arg4[%c0_2, %c0_3], %1 {strides = array<i32>} : memref<2x128xf32, #tpu.memory_space<vmem>>, vector<2x128xf32>,
    return
  }
  func.func @transform_0(%arg0: i32, %arg1: i32, %arg2: i32) -> (i32, i32, i32) {
    %c0_i32 = arith.constant 0 : i32
    return %arg0, %arg2, %arg1 : i32, i32, i32
  }
  func.func @transform_1(%arg0: i32, %arg1: i32, %arg2: i32) -> (i32, i32) {
    %c0_i32 = arith.constant 0 : i32
    return %arg0, %arg1 : i32, i32
  }
}

</mosaic_0001>

<bundles_post_ra>
// kernel: tpu_custom_call.1
= control target key start
LH: loop header
LB: loop body
LE: loop exit
PB: predicated region body
PF: predicated region fallthrough
CT: control target
= control target key end

     0   :  { %6 = vsyncpa [#allocation3], 0  ;;  %s644_s0 = inlined_call_operand.hbm [shape: f32[2,1000,128], index: 0, kind: input, shape index: {}]   ;;  %s645_s1 = inlined_call_operand.hbm [shape: f32[2,128], index: 1, kind: output, shape index: {}]  }
   0x1   :  { %7 = vsyncpa [#allocation4], 0  ;;  %s606_s6 = smov [#allocation2]   ;;  %s558_s10 = scalar_lea.hbm %s644_s0, 32000 }
   0x2   :  { %s13_s7 = sshll.u32 %s606_s6, 4  ;;  %p559_p0 = scmp.ne.s32.totalorder %s644_s0, %s558_s10  ;;  %s14_s7 = int_to_ptr.vmem [resolvable:$true] %s13_s7 }
   0x3   :  { %p562_p1 = scmp.lt.u32.totalorder %s558_s10, %s644_s0 }
   0x5   :  { %p564_p2 = pnand %p562_p1, %p559_p0 }
   0x7   :  { %567 = shalt.err (!%p564_p2)
}
   0x8   :  { %s568_s15 = scalar_lea.vmem %s14_s7, 32000  ;;  %p573_p4 = scmp.lt.s32.totalorder %s14_s7, %s14_s7 }
   0x9   :  { %p569_p3 = scmp.ne.s32.totalorder %s14_s7, %s568_s15  ;;  %p574_p5 = scmp.lt.s32.totalorder %s568_s15, %s568_s15 }
   0xb   :  { %p575_p6 = por %p574_p5, %p573_p4 }
   0xd   :  { %p576_p7 = pnand %p575_p6, %p569_p3 }
   0xf   :  { %579 = shalt.err (!%p576_p7)
}
  0x10   :  { %s607_s16 = smov 128   ;;  %s608_s17 = smov 8  }
  0x11   :  { %19 = dma.hbm_to_vmem [thread:$0]  %s644_s0, 32000, %s14_s7, [#allocation3], %s607_s16, %s607_s16, %s608_s17  }
  0x12   :  { %602 = dma.done.wait [#allocation3], 32000  }
  0x13   :  { %603 = vsyncadd [#allocation3], 4294935296  ;;  %v27_v0 = vld [vmem:[#allocation2 + $0x20] sm:$0xff]  ;;  %v28_v1 = vld [vmem:[#allocation2 + $0x28] sm:$0xff]  ;;  %s609_s0 = smov [#allocation5]   ;;  %vm535_vm0 = vcmask 1041409  }
  0x14   :  { %v275_v2 = vmax.f32 %v28_v1, %v27_v0  ;;  %v29_v3 = vld [vmem:[#allocation2 + $0x30] sm:$0xff]  ;;  %v30_v4 = vld [vmem:[#allocation2 + $0x38] sm:$0xff]  ;;  %v31_v6 = vld [vmem:[#allocation2 + $0x40] sm:$0xff]  ;;  %s545_s20 = sshll.u32 %s609_s0, 4  ;;  %s546_s20 = int_to_ptr.vmem [resolvable:$true] %s545_s20 }
  0x15   :  { %v32_v8 = vld [vmem:[#allocation2 + $0x48] sm:$0xff]  ;;  %v33_v10 = vld [vmem:[#allocation2 + $0x50] sm:$0xff]  ;;  %v34_v12 = vld [vmem:[#allocation2 + $0x58] sm:$0xff]  ;;  %s580_s21 = scalar_lea.vmem %s546_s20, 32  ;;  %p585_p9 = scmp.lt.s32.totalorder %s546_s20, %s546_s20 }
  0x16   :  { %v276_v5 = vmax.f32 %v29_v3, %v275_v2  ;;  %v35_v14 = vld [vmem:[#allocation2 + $0x60] sm:$0xff]  ;;  %v36_v16 = vld [vmem:[#allocation2 + $0x68] sm:$0xff]  ;;  %v37_v18 = vld [vmem:[#allocation2 + $0x70] sm:$0xff]  ;;  %p581_p8 = scmp.ne.s32.totalorder %s546_s20, %s580_s21  ;;  %p586_p10 = scmp.lt.s32.totalorder %s580_s21, %s580_s21 }
  0x17   :  { %v38_v20 = vld [vmem:[#allocation2 + $0x78] sm:$0xff]  ;;  %v39_v22 = vld [vmem:[#allocation2 + $0x80] sm:$0xff]  ;;  %v40_v24 = vld [vmem:[#allocation2 + $0x88] sm:$0xff] }
  0x18   :  { %v277_v7 = vmax.f32 %v30_v4, %v276_v5  ;;  %v41_v26 = vld [vmem:[#allocation2 + $0x90] sm:$0xff]  ;;  %v42_v28 = vld [vmem:[#allocation2 + $0x98] sm:$0xff]  ;;  %v152_v29 = vld [vmem:[#allocation2 + $0x408] sm:$0xff]  ;;  %p587_p11 = por %p586_p10, %p585_p9 }
  0x19   :  { %v153_v31 = vld [vmem:[#allocation2 + $0x410] sm:$0xff]  ;;  %v154_v32 = vld [vmem:[#allocation2 + $0x418] sm:$0xff]  ;;  %v43_v33 = vld [vmem:[#allocation2 + $0xa0] sm:$0xff] }
  0x1a   :  { %v278_v9 = vmax.f32 %v31_v6, %v277_v7  ;;  %v405_v34 = vmax.f32 %v153_v31, %v152_v29  ;;  %v155_v36 = vld [vmem:[#allocation2 + $0x420] sm:$0xff]  ;;  %v44_v37 = vld [vmem:[#allocation2 + $0xa8] sm:$0xff]  ;;  %v45_v41 = vld [vmem:[#allocation2 + $0xb0] sm:$0xff]  ;;  %p588_p12 = pnand %p587_p11, %p581_p8 }
  0x1b   :  { %v156_v40 = vld [vmem:[#allocation2 + $0x428] sm:$0xff]  ;;  %v157_v44 = vld [vmem:[#allocation2 + $0x430] sm:$0xff]  ;;  %v46_v45 = vld [vmem:[#allocation2 + $0xb8] sm:$0xff] }
  0x1c   :  { %v279_v11 = vmax.f32 %v32_v8, %v278_v9  ;;  %v406_v38 = vmax.f32 %v154_v32, %v405_v34  ;;  %v158_v48 = vld [vmem:[#allocation2 + $0x438] sm:$0xff]  ;;  %v47_v49 = vld [vmem:[#allocation2 + $0xc0] sm:$0xff]  ;;  %v48_v53 = vld [vmem:[#allocation2 + $0xc8] sm:$0xff] }
  0x1d   :  { %v159_v52 = vld [vmem:[#allocation2 + $0x440] sm:$0xff]  ;;  %v160_v56 = vld [vmem:[#allocation2 + $0x448] sm:$0xff]  ;;  %v49_v57 = vld [vmem:[#allocation2 + $0xd0] sm:$0xff] }
  0x1e   :  { %v280_v13 = vmax.f32 %v33_v10, %v279_v11  ;;  %v407_v42 = vmax.f32 %v155_v36, %v406_v38  ;;  %v161_v60 = vld [vmem:[#allocation2 + $0x450] sm:$0xff]  ;;  %v50_v61 = vld [vmem:[#allocation2 + $0xd8] sm:$0xff]  ;;  %v51_v1 = vld [vmem:[#allocation2 + $0xe0] sm:$0xff] }
  0x1f   :  { %v162_v0 = vld [vmem:[#allocation2 + $0x458] sm:$0xff]  ;;  %v163_v4 = vld [vmem:[#allocation2 + $0x460] sm:$0xff]  ;;  %v52_v5 = vld [vmem:[#allocation2 + $0xe8] sm:$0xff] }
  0x20   :  { %v281_v15 = vmax.f32 %v34_v12, %v280_v13  ;;  %v408_v46 = vmax.f32 %v156_v40, %v407_v42  ;;  %v164_v8 = vld [vmem:[#allocation2 + $0x468] sm:$0xff]  ;;  %v53_v9 = vld [vmem:[#allocation2 + $0xf0] sm:$0xff]  ;;  %v54_v13 = vld [vmem:[#allocation2 + $0xf8] sm:$0xff] }
  0x21   :  { %v165_v12 = vld [vmem:[#allocation2 + $0x470] sm:$0xff]  ;;  %v58_v29 = vld [vmem:[#allocation2 + $0x118] sm:$0xff]  ;;  %v171_v36 = vld [vmem:[#allocation2 + $0x4a0] sm:$0xff] }
  0x22   :  { %v282_v17 = vmax.f32 %v35_v14, %v281_v15  ;;  %v409_v50 = vmax.f32 %v157_v44, %v408_v46  ;;  %v170_v32 = vld [vmem:[#allocation2 + $0x498] sm:$0xff]  ;;  %v172_v40 = vld [vmem:[#allocation2 + $0x4a8] sm:$0xff]  ;;  %v173_v44 = vld [vmem:[#allocation2 + $0x4b0] sm:$0xff] }
  0x24   :  { %v283_v19 = vmax.f32 %v36_v16, %v282_v17  ;;  %v410_v54 = vmax.f32 %v158_v48, %v409_v50  ;;  %v166_v16 = vld [vmem:[#allocation2 + $0x478] sm:$0xff]  ;;  %v55_v17 = vld [vmem:[#allocation2 + $0x100] sm:$0xff] }
  0x25   :  { %v174_v48 = vld [vmem:[#allocation2 + $0x4b8] sm:$0xff] }
  0x26   :  { %v284_v21 = vmax.f32 %v37_v18, %v283_v19  ;;  %v411_v58 = vmax.f32 %v159_v52, %v410_v54  ;;  %v175_v52 = vld [vmem:[#allocation2 + $0x4c0] sm:$0xff] }
  0x28   :  { %v285_v23 = vmax.f32 %v38_v20, %v284_v21  ;;  %v412_v62 = vmax.f32 %v160_v56, %v411_v58  ;;  %v167_v20 = vld [vmem:[#allocation2 + $0x480] sm:$0xff]  ;;  %v56_v21 = vld [vmem:[#allocation2 + $0x108] sm:$0xff] }
  0x29   :  { %v176_v56 = vld [vmem:[#allocation2 + $0x4c8] sm:$0xff] }
  0x2a   :  { %v286_v25 = vmax.f32 %v39_v22, %v285_v23  ;;  %v413_v2 = vmax.f32 %v161_v60, %v412_v62  ;;  %v177_v60 = vld [vmem:[#allocation2 + $0x4d0] sm:$0xff] }
  0x2c   :  { %v287_v27 = vmax.f32 %v40_v24, %v286_v25  ;;  %v414_v6 = vmax.f32 %v162_v0, %v413_v2  ;;  %v168_v24 = vld [vmem:[#allocation2 + $0x488] sm:$0xff]  ;;  %v57_v25 = vld [vmem:[#allocation2 + $0x110] sm:$0xff]  ;;  %v178_v0 = vld [vmem:[#allocation2 + $0x4d8] sm:$0xff] }
  0x2e   :  { %v288_v30 = vmax.f32 %v41_v26, %v287_v27  ;;  %v415_v10 = vmax.f32 %v163_v4, %v414_v6  ;;  %v179_v4 = vld [vmem:[#allocation2 + $0x4e0] sm:$0xff] }
  0x30   :  { %v289_v35 = vmax.f32 %v42_v28, %v288_v30  ;;  %v416_v14 = vmax.f32 %v164_v8, %v415_v10  ;;  %v169_v28 = vld [vmem:[#allocation2 + $0x490] sm:$0xff]  ;;  %v180_v8 = vld [vmem:[#allocation2 + $0x4e8] sm:$0xff] }
  0x32   :  { %v290_v39 = vmax.f32 %v43_v33, %v289_v35  ;;  %v417_v18 = vmax.f32 %v165_v12, %v416_v14  ;;  %v59_v33 = vld [vmem:[#allocation2 + $0x120] sm:$0xff]  ;;  %v181_v12 = vld [vmem:[#allocation2 + $0x4f0] sm:$0xff] }
  0x34   :  { %v291_v43 = vmax.f32 %v44_v37, %v290_v39  ;;  %v418_v22 = vmax.f32 %v166_v16, %v417_v18  ;;  %v60_v37 = vld [vmem:[#allocation2 + $0x128] sm:$0xff]  ;;  %v182_v16 = vld [vmem:[#allocation2 + $0x4f8] sm:$0xff] }
  0x36   :  { %v292_v47 = vmax.f32 %v45_v41, %v291_v43  ;;  %v419_v26 = vmax.f32 %v167_v20, %v418_v22  ;;  %v61_v41 = vld [vmem:[#allocation2 + $0x130] sm:$0xff]  ;;  %v183_v20 = vld [vmem:[#allocation2 + $0x500] sm:$0xff] }
  0x38   :  { %v293_v51 = vmax.f32 %v46_v45, %v292_v47  ;;  %v420_v30 = vmax.f32 %v168_v24, %v419_v26  ;;  %v62_v45 = vld [vmem:[#allocation2 + $0x138] sm:$0xff]  ;;  %v184_v24 = vld [vmem:[#allocation2 + $0x508] sm:$0xff] }
  0x3a   :  { %v294_v55 = vmax.f32 %v47_v49, %v293_v51  ;;  %v421_v34 = vmax.f32 %v169_v28, %v420_v30  ;;  %v63_v49 = vld [vmem:[#allocation2 + $0x140] sm:$0xff]  ;;  %v185_v28 = vld [vmem:[#allocation2 + $0x510] sm:$0xff] }
  0x3c   :  { %v295_v59 = vmax.f32 %v48_v53, %v294_v55  ;;  %v422_v38 = vmax.f32 %v170_v32, %v421_v34  ;;  %v64_v53 = vld [vmem:[#allocation2 + $0x148] sm:$0xff]  ;;  %v186_v32 = vld [vmem:[#allocation2 + $0x518] sm:$0xff] }
  0x3e   :  { %v296_v63 = vmax.f32 %v49_v57, %v295_v59  ;;  %v423_v42 = vmax.f32 %v171_v36, %v422_v38  ;;  %v65_v57 = vld [vmem:[#allocation2 + $0x150] sm:$0xff]  ;;  %v187_v36 = vld [vmem:[#allocation2 + $0x520] sm:$0xff] }
  0x40   :  { %v297_v3 = vmax.f32 %v50_v61, %v296_v63  ;;  %v424_v46 = vmax.f32 %v172_v40, %v423_v42  ;;  %v66_v61 = vld [vmem:[#allocation2 + $0x158] sm:$0xff]  ;;  %v188_v40 = vld [vmem:[#allocation2 + $0x528] sm:$0xff] }
  0x42   :  { %v298_v7 = vmax.f32 %v51_v1, %v297_v3  ;;  %v425_v50 = vmax.f32 %v173_v44, %v424_v46  ;;  %v67_v1 = vld [vmem:[#allocation2 + $0x160] sm:$0xff]  ;;  %v189_v44 = vld [vmem:[#allocation2 + $0x530] sm:$0xff] }
  0x44   :  { %v299_v11 = vmax.f32 %v52_v5, %v298_v7  ;;  %v426_v54 = vmax.f32 %v174_v48, %v425_v50  ;;  %v68_v5 = vld [vmem:[#allocation2 + $0x168] sm:$0xff]  ;;  %v190_v48 = vld [vmem:[#allocation2 + $0x538] sm:$0xff] }
  0x46   :  { %v300_v15 = vmax.f32 %v53_v9, %v299_v11  ;;  %v427_v58 = vmax.f32 %v175_v52, %v426_v54  ;;  %v69_v9 = vld [vmem:[#allocation2 + $0x170] sm:$0xff]  ;;  %v191_v52 = vld [vmem:[#allocation2 + $0x540] sm:$0xff] }
  0x48   :  { %v301_v19 = vmax.f32 %v54_v13, %v300_v15  ;;  %v428_v62 = vmax.f32 %v176_v56, %v427_v58  ;;  %v70_v13 = vld [vmem:[#allocation2 + $0x178] sm:$0xff]  ;;  %v192_v56 = vld [vmem:[#allocation2 + $0x548] sm:$0xff] }
  0x4a   :  { %v302_v23 = vmax.f32 %v55_v17, %v301_v19  ;;  %v429_v2 = vmax.f32 %v177_v60, %v428_v62  ;;  %v71_v17 = vld [vmem:[#allocation2 + $0x180] sm:$0xff]  ;;  %v193_v60 = vld [vmem:[#allocation2 + $0x550] sm:$0xff] }
  0x4c   :  { %v303_v27 = vmax.f32 %v56_v21, %v302_v23  ;;  %v430_v6 = vmax.f32 %v178_v0, %v429_v2  ;;  %v72_v21 = vld [vmem:[#allocation2 + $0x188] sm:$0xff]  ;;  %v194_v0 = vld [vmem:[#allocation2 + $0x558] sm:$0xff] }
  0x4e   :  { %v304_v31 = vmax.f32 %v57_v25, %v303_v27  ;;  %v431_v10 = vmax.f32 %v179_v4, %v430_v6  ;;  %v73_v25 = vld [vmem:[#allocation2 + $0x190] sm:$0xff]  ;;  %v195_v4 = vld [vmem:[#allocation2 + $0x560] sm:$0xff] }
  0x50   :  { %v305_v35 = vmax.f32 %v58_v29, %v304_v31  ;;  %v432_v14 = vmax.f32 %v180_v8, %v431_v10  ;;  %v74_v29 = vld [vmem:[#allocation2 + $0x198] sm:$0xff]  ;;  %v196_v8 = vld [vmem:[#allocation2 + $0x568] sm:$0xff] }
  0x52   :  { %v306_v39 = vmax.f32 %v59_v33, %v305_v35  ;;  %v433_v18 = vmax.f32 %v181_v12, %v432_v14  ;;  %v75_v33 = vld [vmem:[#allocation2 + $0x1a0] sm:$0xff]  ;;  %v197_v12 = vld [vmem:[#allocation2 + $0x570] sm:$0xff] }
  0x54   :  { %v307_v43 = vmax.f32 %v60_v37, %v306_v39  ;;  %v434_v22 = vmax.f32 %v182_v16, %v433_v18  ;;  %v76_v37 = vld [vmem:[#allocation2 + $0x1a8] sm:$0xff]  ;;  %v198_v16 = vld [vmem:[#allocation2 + $0x578] sm:$0xff] }
  0x56   :  { %v308_v47 = vmax.f32 %v61_v41, %v307_v43  ;;  %v435_v26 = vmax.f32 %v183_v20, %v434_v22  ;;  %v77_v41 = vld [vmem:[#allocation2 + $0x1b0] sm:$0xff]  ;;  %v199_v20 = vld [vmem:[#allocation2 + $0x580] sm:$0xff] }
  0x58   :  { %v309_v51 = vmax.f32 %v62_v45, %v308_v47  ;;  %v436_v30 = vmax.f32 %v184_v24, %v435_v26  ;;  %v78_v45 = vld [vmem:[#allocation2 + $0x1b8] sm:$0xff]  ;;  %v200_v24 = vld [vmem:[#allocation2 + $0x588] sm:$0xff] }
  0x5a   :  { %v310_v55 = vmax.f32 %v63_v49, %v309_v51  ;;  %v437_v34 = vmax.f32 %v185_v28, %v436_v30  ;;  %v79_v49 = vld [vmem:[#allocation2 + $0x1c0] sm:$0xff]  ;;  %v201_v28 = vld [vmem:[#allocation2 + $0x590] sm:$0xff] }
  0x5c   :  { %v311_v59 = vmax.f32 %v64_v53, %v310_v55  ;;  %v438_v38 = vmax.f32 %v186_v32, %v437_v34  ;;  %v80_v53 = vld [vmem:[#allocation2 + $0x1c8] sm:$0xff]  ;;  %v202_v32 = vld [vmem:[#allocation2 + $0x598] sm:$0xff] }
  0x5e   :  { %v312_v63 = vmax.f32 %v65_v57, %v311_v59  ;;  %v439_v42 = vmax.f32 %v187_v36, %v438_v38  ;;  %v81_v57 = vld [vmem:[#allocation2 + $0x1d0] sm:$0xff]  ;;  %v203_v36 = vld [vmem:[#allocation2 + $0x5a0] sm:$0xff] }
  0x60   :  { %v313_v3 = vmax.f32 %v66_v61, %v312_v63  ;;  %v440_v46 = vmax.f32 %v188_v40, %v439_v42  ;;  %v82_v61 = vld [vmem:[#allocation2 + $0x1d8] sm:$0xff]  ;;  %v204_v40 = vld [vmem:[#allocation2 + $0x5a8] sm:$0xff] }
  0x62   :  { %v314_v7 = vmax.f32 %v67_v1, %v313_v3  ;;  %v441_v50 = vmax.f32 %v189_v44, %v440_v46  ;;  %v83_v1 = vld [vmem:[#allocation2 + $0x1e0] sm:$0xff]  ;;  %v205_v44 = vld [vmem:[#allocation2 + $0x5b0] sm:$0xff] }
  0x64   :  { %v315_v11 = vmax.f32 %v68_v5, %v314_v7  ;;  %v442_v54 = vmax.f32 %v190_v48, %v441_v50  ;;  %v84_v5 = vld [vmem:[#allocation2 + $0x1e8] sm:$0xff]  ;;  %v206_v48 = vld [vmem:[#allocation2 + $0x5b8] sm:$0xff] }
  0x66   :  { %v316_v15 = vmax.f32 %v69_v9, %v315_v11  ;;  %v443_v58 = vmax.f32 %v191_v52, %v442_v54  ;;  %v85_v9 = vld [vmem:[#allocation2 + $0x1f0] sm:$0xff]  ;;  %v207_v52 = vld [vmem:[#allocation2 + $0x5c0] sm:$0xff] }
  0x68   :  { %v317_v19 = vmax.f32 %v70_v13, %v316_v15  ;;  %v444_v62 = vmax.f32 %v192_v56, %v443_v58  ;;  %v86_v13 = vld [vmem:[#allocation2 + $0x1f8] sm:$0xff]  ;;  %v208_v56 = vld [vmem:[#allocation2 + $0x5c8] sm:$0xff] }
  0x6a   :  { %v318_v23 = vmax.f32 %v71_v17, %v317_v19  ;;  %v445_v2 = vmax.f32 %v193_v60, %v444_v62  ;;  %v87_v17 = vld [vmem:[#allocation2 + $0x200] sm:$0xff]  ;;  %v209_v60 = vld [vmem:[#allocation2 + $0x5d0] sm:$0xff] }
  0x6c   :  { %v319_v27 = vmax.f32 %v72_v21, %v318_v23  ;;  %v446_v6 = vmax.f32 %v194_v0, %v445_v2  ;;  %v88_v21 = vld [vmem:[#allocation2 + $0x208] sm:$0xff]  ;;  %v210_v0 = vld [vmem:[#allocation2 + $0x5d8] sm:$0xff] }
  0x6e   :  { %v320_v31 = vmax.f32 %v73_v25, %v319_v27  ;;  %v447_v10 = vmax.f32 %v195_v4, %v446_v6  ;;  %v89_v25 = vld [vmem:[#allocation2 + $0x210] sm:$0xff]  ;;  %v211_v4 = vld [vmem:[#allocation2 + $0x5e0] sm:$0xff] }
  0x70   :  { %v321_v35 = vmax.f32 %v74_v29, %v320_v31  ;;  %v448_v14 = vmax.f32 %v196_v8, %v447_v10  ;;  %v90_v29 = vld [vmem:[#allocation2 + $0x218] sm:$0xff]  ;;  %v212_v8 = vld [vmem:[#allocation2 + $0x5e8] sm:$0xff] }
  0x72   :  { %v322_v39 = vmax.f32 %v75_v33, %v321_v35  ;;  %v449_v18 = vmax.f32 %v197_v12, %v448_v14  ;;  %v91_v33 = vld [vmem:[#allocation2 + $0x220] sm:$0xff]  ;;  %v213_v12 = vld [vmem:[#allocation2 + $0x5f0] sm:$0xff] }
  0x74   :  { %v323_v43 = vmax.f32 %v76_v37, %v322_v39  ;;  %v450_v22 = vmax.f32 %v198_v16, %v449_v18  ;;  %v92_v37 = vld [vmem:[#allocation2 + $0x228] sm:$0xff]  ;;  %v214_v16 = vld [vmem:[#allocation2 + $0x5f8] sm:$0xff] }
  0x76   :  { %v324_v47 = vmax.f32 %v77_v41, %v323_v43  ;;  %v451_v26 = vmax.f32 %v199_v20, %v450_v22  ;;  %v93_v41 = vld [vmem:[#allocation2 + $0x230] sm:$0xff]  ;;  %v215_v20 = vld [vmem:[#allocation2 + $0x600] sm:$0xff] }
  0x78   :  { %v325_v51 = vmax.f32 %v78_v45, %v324_v47  ;;  %v452_v30 = vmax.f32 %v200_v24, %v451_v26  ;;  %v94_v45 = vld [vmem:[#allocation2 + $0x238] sm:$0xff]  ;;  %v216_v24 = vld [vmem:[#allocation2 + $0x608] sm:$0xff] }
  0x7a   :  { %v326_v55 = vmax.f32 %v79_v49, %v325_v51  ;;  %v453_v34 = vmax.f32 %v201_v28, %v452_v30  ;;  %v95_v49 = vld [vmem:[#allocation2 + $0x240] sm:$0xff]  ;;  %v217_v28 = vld [vmem:[#allocation2 + $0x610] sm:$0xff] }
  0x7c   :  { %v327_v59 = vmax.f32 %v80_v53, %v326_v55  ;;  %v454_v38 = vmax.f32 %v202_v32, %v453_v34  ;;  %v96_v53 = vld [vmem:[#allocation2 + $0x248] sm:$0xff]  ;;  %v218_v32 = vld [vmem:[#allocation2 + $0x618] sm:$0xff] }
  0x7e   :  { %v328_v63 = vmax.f32 %v81_v57, %v327_v59  ;;  %v455_v42 = vmax.f32 %v203_v36, %v454_v38  ;;  %v97_v57 = vld [vmem:[#allocation2 + $0x250] sm:$0xff]  ;;  %v219_v36 = vld [vmem:[#allocation2 + $0x620] sm:$0xff] }
  0x80   :  { %v329_v3 = vmax.f32 %v82_v61, %v328_v63  ;;  %v456_v46 = vmax.f32 %v204_v40, %v455_v42  ;;  %v98_v61 = vld [vmem:[#allocation2 + $0x258] sm:$0xff]  ;;  %v220_v40 = vld [vmem:[#allocation2 + $0x628] sm:$0xff] }
  0x82   :  { %v330_v7 = vmax.f32 %v83_v1, %v329_v3  ;;  %v457_v50 = vmax.f32 %v205_v44, %v456_v46  ;;  %v99_v1 = vld [vmem:[#allocation2 + $0x260] sm:$0xff]  ;;  %v221_v44 = vld [vmem:[#allocation2 + $0x630] sm:$0xff] }
  0x84   :  { %v331_v11 = vmax.f32 %v84_v5, %v330_v7  ;;  %v458_v54 = vmax.f32 %v206_v48, %v457_v50  ;;  %v100_v5 = vld [vmem:[#allocation2 + $0x268] sm:$0xff]  ;;  %v222_v48 = vld [vmem:[#allocation2 + $0x638] sm:$0xff] }
  0x86   :  { %v332_v15 = vmax.f32 %v85_v9, %v331_v11  ;;  %v459_v58 = vmax.f32 %v207_v52, %v458_v54  ;;  %v101_v9 = vld [vmem:[#allocation2 + $0x270] sm:$0xff]  ;;  %v223_v52 = vld [vmem:[#allocation2 + $0x640] sm:$0xff] }
  0x88   :  { %v333_v19 = vmax.f32 %v86_v13, %v332_v15  ;;  %v460_v62 = vmax.f32 %v208_v56, %v459_v58  ;;  %v102_v13 = vld [vmem:[#allocation2 + $0x278] sm:$0xff]  ;;  %v224_v56 = vld [vmem:[#allocation2 + $0x648] sm:$0xff] }
  0x8a   :  { %v334_v23 = vmax.f32 %v87_v17, %v333_v19  ;;  %v461_v2 = vmax.f32 %v209_v60, %v460_v62  ;;  %v103_v17 = vld [vmem:[#allocation2 + $0x280] sm:$0xff]  ;;  %v225_v60 = vld [vmem:[#allocation2 + $0x650] sm:$0xff] }
  0x8c   :  { %v335_v27 = vmax.f32 %v88_v21, %v334_v23  ;;  %v462_v6 = vmax.f32 %v210_v0, %v461_v2  ;;  %v104_v21 = vld [vmem:[#allocation2 + $0x288] sm:$0xff]  ;;  %v226_v0 = vld [vmem:[#allocation2 + $0x658] sm:$0xff] }
  0x8e   :  { %v336_v31 = vmax.f32 %v89_v25, %v335_v27  ;;  %v463_v10 = vmax.f32 %v211_v4, %v462_v6  ;;  %v105_v25 = vld [vmem:[#allocation2 + $0x290] sm:$0xff]  ;;  %v227_v4 = vld [vmem:[#allocation2 + $0x660] sm:$0xff] }
  0x90   :  { %v337_v35 = vmax.f32 %v90_v29, %v336_v31  ;;  %v464_v14 = vmax.f32 %v212_v8, %v463_v10  ;;  %v106_v29 = vld [vmem:[#allocation2 + $0x298] sm:$0xff]  ;;  %v228_v8 = vld [vmem:[#allocation2 + $0x668] sm:$0xff] }
  0x92   :  { %v338_v39 = vmax.f32 %v91_v33, %v337_v35  ;;  %v465_v18 = vmax.f32 %v213_v12, %v464_v14  ;;  %v107_v33 = vld [vmem:[#allocation2 + $0x2a0] sm:$0xff]  ;;  %v229_v12 = vld [vmem:[#allocation2 + $0x670] sm:$0xff] }
  0x94   :  { %v339_v43 = vmax.f32 %v92_v37, %v338_v39  ;;  %v466_v22 = vmax.f32 %v214_v16, %v465_v18  ;;  %v108_v37 = vld [vmem:[#allocation2 + $0x2a8] sm:$0xff]  ;;  %v230_v16 = vld [vmem:[#allocation2 + $0x678] sm:$0xff] }
  0x96   :  { %v340_v47 = vmax.f32 %v93_v41, %v339_v43  ;;  %v467_v26 = vmax.f32 %v215_v20, %v466_v22  ;;  %v109_v41 = vld [vmem:[#allocation2 + $0x2b0] sm:$0xff]  ;;  %v231_v20 = vld [vmem:[#allocation2 + $0x680] sm:$0xff] }
  0x98   :  { %v341_v51 = vmax.f32 %v94_v45, %v340_v47  ;;  %v468_v30 = vmax.f32 %v216_v24, %v467_v26  ;;  %v110_v45 = vld [vmem:[#allocation2 + $0x2b8] sm:$0xff]  ;;  %v232_v24 = vld [vmem:[#allocation2 + $0x688] sm:$0xff] }
  0x9a   :  { %v342_v55 = vmax.f32 %v95_v49, %v341_v51  ;;  %v469_v34 = vmax.f32 %v217_v28, %v468_v30  ;;  %v111_v49 = vld [vmem:[#allocation2 + $0x2c0] sm:$0xff]  ;;  %v233_v28 = vld [vmem:[#allocation2 + $0x690] sm:$0xff] }
  0x9c   :  { %v343_v59 = vmax.f32 %v96_v53, %v342_v55  ;;  %v470_v38 = vmax.f32 %v218_v32, %v469_v34  ;;  %v112_v53 = vld [vmem:[#allocation2 + $0x2c8] sm:$0xff]  ;;  %v234_v32 = vld [vmem:[#allocation2 + $0x698] sm:$0xff] }
  0x9e   :  { %v344_v63 = vmax.f32 %v97_v57, %v343_v59  ;;  %v471_v42 = vmax.f32 %v219_v36, %v470_v38  ;;  %v113_v57 = vld [vmem:[#allocation2 + $0x2d0] sm:$0xff]  ;;  %v235_v36 = vld [vmem:[#allocation2 + $0x6a0] sm:$0xff] }
  0xa0   :  { %v345_v3 = vmax.f32 %v98_v61, %v344_v63  ;;  %v472_v46 = vmax.f32 %v220_v40, %v471_v42  ;;  %v114_v61 = vld [vmem:[#allocation2 + $0x2d8] sm:$0xff]  ;;  %v236_v40 = vld [vmem:[#allocation2 + $0x6a8] sm:$0xff] }
  0xa2   :  { %v346_v7 = vmax.f32 %v99_v1, %v345_v3  ;;  %v473_v50 = vmax.f32 %v221_v44, %v472_v46  ;;  %v115_v1 = vld [vmem:[#allocation2 + $0x2e0] sm:$0xff]  ;;  %v237_v44 = vld [vmem:[#allocation2 + $0x6b0] sm:$0xff] }
  0xa4   :  { %v347_v11 = vmax.f32 %v100_v5, %v346_v7  ;;  %v474_v54 = vmax.f32 %v222_v48, %v473_v50  ;;  %v116_v5 = vld [vmem:[#allocation2 + $0x2e8] sm:$0xff]  ;;  %v238_v48 = vld [vmem:[#allocation2 + $0x6b8] sm:$0xff] }
  0xa6   :  { %v348_v15 = vmax.f32 %v101_v9, %v347_v11  ;;  %v475_v58 = vmax.f32 %v223_v52, %v474_v54  ;;  %v117_v9 = vld [vmem:[#allocation2 + $0x2f0] sm:$0xff]  ;;  %v239_v52 = vld [vmem:[#allocation2 + $0x6c0] sm:$0xff] }
  0xa8   :  { %v349_v19 = vmax.f32 %v102_v13, %v348_v15  ;;  %v476_v62 = vmax.f32 %v224_v56, %v475_v58  ;;  %v118_v13 = vld [vmem:[#allocation2 + $0x2f8] sm:$0xff]  ;;  %v240_v56 = vld [vmem:[#allocation2 + $0x6c8] sm:$0xff] }
  0xaa   :  { %v350_v23 = vmax.f32 %v103_v17, %v349_v19  ;;  %v477_v2 = vmax.f32 %v225_v60, %v476_v62  ;;  %v119_v17 = vld [vmem:[#allocation2 + $0x300] sm:$0xff]  ;;  %v241_v60 = vld [vmem:[#allocation2 + $0x6d0] sm:$0xff] }
  0xac   :  { %v351_v27 = vmax.f32 %v104_v21, %v350_v23  ;;  %v478_v6 = vmax.f32 %v226_v0, %v477_v2  ;;  %v120_v21 = vld [vmem:[#allocation2 + $0x308] sm:$0xff]  ;;  %v242_v0 = vld [vmem:[#allocation2 + $0x6d8] sm:$0xff] }
  0xae   :  { %v352_v31 = vmax.f32 %v105_v25, %v351_v27  ;;  %v479_v10 = vmax.f32 %v227_v4, %v478_v6  ;;  %v121_v25 = vld [vmem:[#allocation2 + $0x310] sm:$0xff]  ;;  %v243_v4 = vld [vmem:[#allocation2 + $0x6e0] sm:$0xff] }
  0xb0   :  { %v353_v35 = vmax.f32 %v106_v29, %v352_v31  ;;  %v480_v14 = vmax.f32 %v228_v8, %v479_v10  ;;  %v122_v29 = vld [vmem:[#allocation2 + $0x318] sm:$0xff]  ;;  %v244_v8 = vld [vmem:[#allocation2 + $0x6e8] sm:$0xff] }
  0xb2   :  { %v354_v39 = vmax.f32 %v107_v33, %v353_v35  ;;  %v481_v18 = vmax.f32 %v229_v12, %v480_v14  ;;  %v123_v33 = vld [vmem:[#allocation2 + $0x320] sm:$0xff]  ;;  %v245_v12 = vld [vmem:[#allocation2 + $0x6f0] sm:$0xff] }
  0xb4   :  { %v355_v43 = vmax.f32 %v108_v37, %v354_v39  ;;  %v482_v22 = vmax.f32 %v230_v16, %v481_v18  ;;  %v124_v37 = vld [vmem:[#allocation2 + $0x328] sm:$0xff]  ;;  %v246_v16 = vld [vmem:[#allocation2 + $0x6f8] sm:$0xff] }
  0xb6   :  { %v356_v47 = vmax.f32 %v109_v41, %v355_v43  ;;  %v483_v26 = vmax.f32 %v231_v20, %v482_v22  ;;  %v125_v41 = vld [vmem:[#allocation2 + $0x330] sm:$0xff]  ;;  %v247_v20 = vld [vmem:[#allocation2 + $0x700] sm:$0xff] }
  0xb8   :  { %v357_v51 = vmax.f32 %v110_v45, %v356_v47  ;;  %v484_v30 = vmax.f32 %v232_v24, %v483_v26  ;;  %v126_v45 = vld [vmem:[#allocation2 + $0x338] sm:$0xff]  ;;  %v248_v24 = vld [vmem:[#allocation2 + $0x708] sm:$0xff] }
  0xba   :  { %v358_v55 = vmax.f32 %v111_v49, %v357_v51  ;;  %v485_v34 = vmax.f32 %v233_v28, %v484_v30  ;;  %v127_v49 = vld [vmem:[#allocation2 + $0x340] sm:$0xff]  ;;  %v249_v28 = vld [vmem:[#allocation2 + $0x710] sm:$0xff] }
  0xbc   :  { %v359_v59 = vmax.f32 %v112_v53, %v358_v55  ;;  %v486_v38 = vmax.f32 %v234_v32, %v485_v34  ;;  %v128_v53 = vld [vmem:[#allocation2 + $0x348] sm:$0xff]  ;;  %v250_v32 = vld [vmem:[#allocation2 + $0x718] sm:$0xff] }
  0xbe   :  { %v360_v63 = vmax.f32 %v113_v57, %v359_v59  ;;  %v487_v42 = vmax.f32 %v235_v36, %v486_v38  ;;  %v129_v57 = vld [vmem:[#allocation2 + $0x350] sm:$0xff]  ;;  %v251_v36 = vld [vmem:[#allocation2 + $0x720] sm:$0xff] }
  0xc0   :  { %v361_v3 = vmax.f32 %v114_v61, %v360_v63  ;;  %v488_v46 = vmax.f32 %v236_v40, %v487_v42  ;;  %v130_v61 = vld [vmem:[#allocation2 + $0x358] sm:$0xff]  ;;  %v252_v40 = vld [vmem:[#allocation2 + $0x728] sm:$0xff] }
  0xc2   :  { %v362_v7 = vmax.f32 %v115_v1, %v361_v3  ;;  %v489_v50 = vmax.f32 %v237_v44, %v488_v46  ;;  %v131_v1 = vld [vmem:[#allocation2 + $0x360] sm:$0xff]  ;;  %v253_v44 = vld [vmem:[#allocation2 + $0x730] sm:$0xff] }
  0xc4   :  { %v363_v11 = vmax.f32 %v116_v5, %v362_v7  ;;  %v490_v54 = vmax.f32 %v238_v48, %v489_v50  ;;  %v132_v5 = vld [vmem:[#allocation2 + $0x368] sm:$0xff]  ;;  %v254_v48 = vld [vmem:[#allocation2 + $0x738] sm:$0xff] }
  0xc6   :  { %v364_v15 = vmax.f32 %v117_v9, %v363_v11  ;;  %v491_v58 = vmax.f32 %v239_v52, %v490_v54  ;;  %v133_v9 = vld [vmem:[#allocation2 + $0x370] sm:$0xff]  ;;  %v255_v52 = vld [vmem:[#allocation2 + $0x740] sm:$0xff]  ;;  %v256_v54 = vld [vmem:[#allocation2 + $0x748] sm:$0xff] }
  0xc8   :  { %v365_v19 = vmax.f32 %v118_v13, %v364_v15  ;;  %v492_v62 = vmax.f32 %v240_v56, %v491_v58  ;;  %v134_v13 = vld [vmem:[#allocation2 + $0x378] sm:$0xff]  ;;  %v257_v58 = vld [vmem:[#allocation2 + $0x750] sm:$0xff] }
  0xca   :  { %v366_v23 = vmax.f32 %v119_v17, %v365_v19  ;;  %v493_v2 = vmax.f32 %v241_v60, %v492_v62  ;;  %v135_v17 = vld [vmem:[#allocation2 + $0x380] sm:$0xff]  ;;  %v258_v60 = vld [vmem:[#allocation2 + $0x758] sm:$0xff] }
  0xcc   :  { %v367_v27 = vmax.f32 %v120_v21, %v366_v23  ;;  %v494_v6 = vmax.f32 %v242_v0, %v493_v2  ;;  %v136_v21 = vld [vmem:[#allocation2 + $0x388] sm:$0xff]  ;;  %v259_v0 = vld [vmem:[#allocation2 + $0x760] sm:$0xff] }
  0xcd   :  { %v260_v2 = vld [vmem:[#allocation2 + $0x768] sm:$0xff] }
  0xce   :  { %v368_v31 = vmax.f32 %v121_v25, %v367_v27  ;;  %v495_v10 = vmax.f32 %v243_v4, %v494_v6  ;;  %v137_v25 = vld [vmem:[#allocation2 + $0x390] sm:$0xff] }
  0xcf   :  { %v261_v6 = vld [vmem:[#allocation2 + $0x770] sm:$0xff] }
  0xd0   :  { %v369_v35 = vmax.f32 %v122_v29, %v368_v31  ;;  %v496_v14 = vmax.f32 %v244_v8, %v495_v10  ;;  %v138_v29 = vld [vmem:[#allocation2 + $0x398] sm:$0xff] }
  0xd1   :  { %v262_v8 = vld [vmem:[#allocation2 + $0x778] sm:$0xff] }
  0xd2   :  { %v370_v39 = vmax.f32 %v123_v33, %v369_v35  ;;  %v497_v18 = vmax.f32 %v245_v12, %v496_v14  ;;  %v139_v33 = vld [vmem:[#allocation2 + $0x3a0] sm:$0xff]  ;;  %v25_v12 = vld [vmem:[#allocation2 + $0x10] sm:$0xff] }
  0xd3   :  { %v263_v14 = vld [vmem:[#allocation2 + $0x780] sm:$0xff] }
  0xd4   :  { %v371_v43 = vmax.f32 %v124_v37, %v370_v39  ;;  %v498_v22 = vmax.f32 %v246_v16, %v497_v18  ;;  %v140_v37 = vld [vmem:[#allocation2 + $0x3a8] sm:$0xff] }
  0xd5   :  { %v264_v16 = vld [vmem:[#allocation2 + $0x788] sm:$0xff] }
  0xd6   :  { %v372_v47 = vmax.f32 %v125_v41, %v371_v43  ;;  %v499_v26 = vmax.f32 %v247_v20, %v498_v22  ;;  %v141_v41 = vld [vmem:[#allocation2 + $0x3b0] sm:$0xff]  ;;  %v24_v20 = vld [vmem:[#allocation2 + $0x8] sm:$0xff] }
  0xd7   :  { %v265_v22 = vld [vmem:[#allocation2 + $0x790] sm:$0xff] }
  0xd8   :  { %v373_v51 = vmax.f32 %v126_v45, %v372_v47  ;;  %v500_v30 = vmax.f32 %v248_v24, %v499_v26  ;;  %v142_v45 = vld [vmem:[#allocation2 + $0x3b8] sm:$0xff] }
  0xd9   :  { %v266_v24 = vld [vmem:[#allocation2 + $0x798] sm:$0xff] }
  0xda   :  { %v374_v55 = vmax.f32 %v127_v49, %v373_v51  ;;  %v501_v34 = vmax.f32 %v249_v28, %v500_v30  ;;  %v143_v51 = vld [vmem:[#allocation2 + $0x3c0] sm:$0xff]  ;;  %v268_v30 = vld [vmem:[#allocation2 + $0x7a8] sm:$0xff] }
  0xdb   :  { %v267_v28 = vld [vmem:[#allocation2 + $0x7a0] sm:$0xff] }
  0xdc   :  { %v375_v59 = vmax.f32 %v128_v53, %v374_v55  ;;  %v502_v38 = vmax.f32 %v250_v32, %v501_v34 }
  0xde   :  { %v376_v63 = vmax.f32 %v129_v57, %v375_v59  ;;  %v503_v42 = vmax.f32 %v251_v36, %v502_v38  ;;  %v144_v57 = vld [vmem:[#allocation2 + $0x3c8] sm:$0xff] }
  0xdf   :  { %v148_v38 = vld [vmem:[#allocation2 + $0x3e8] sm:$0xff] }
  0xe0   :  { %v377_v3 = vmax.f32 %v130_v61, %v376_v63  ;;  %v504_v46 = vmax.f32 %v252_v40, %v503_v42  ;;  %v145_v63 = vld [vmem:[#allocation2 + $0x3d0] sm:$0xff]  ;;  %v271_v40 = vld [vmem:[#allocation2 + $0x7c0] sm:$0xff] }
  0xe1   :  { %v149_v42 = vld [vmem:[#allocation2 + $0x3f0] sm:$0xff] }
  0xe2   :  { %v378_v7 = vmax.f32 %v131_v1, %v377_v3  ;;  %v505_v49 = vmax.f32 %v253_v44, %v504_v46  ;;  %v272_v44 = vld [vmem:[#allocation2 + $0x7c8] sm:$0xff] }
  0xe4   :  { %v379_v11 = vmax.f32 %v132_v5, %v378_v7  ;;  %v506_v53 = vmax.f32 %v254_v48, %v505_v49  ;;  %v146_v5 = vld [vmem:[#allocation2 + $0x3d8] sm:$0xff] }
  0xe6   :  { %v380_v15 = vmax.f32 %v133_v9, %v379_v11  ;;  %v507_v56 = vmax.f32 %v255_v52, %v506_v53  ;;  %v23_v9 = vld [vmem:[#allocation2] sm:$0xff] }
  0xe8   :  { %v381_v19 = vmax.f32 %v134_v13, %v380_v15  ;;  %v508_v59 = vmax.f32 %v256_v54, %v507_v56  ;;  %v147_v13 = vld [vmem:[#allocation2 + $0x3e0] sm:$0xff] }
  0xea   :  { %v382_v23 = vmax.f32 %v135_v17, %v381_v19  ;;  %v509_v62 = vmax.f32 %v257_v58, %v508_v59  ;;  %v273_v19 = vmax.f32 %v23_v9, %v25_v12 }
  0xec   :  { %v383_v27 = vmax.f32 %v136_v21, %v382_v23  ;;  %v510_v1 = vmax.f32 %v258_v60, %v509_v62  ;;  %v26_v21 = vld [vmem:[#allocation2 + $0x18] sm:$0xff] }
  0xee   :  { %v384_v31 = vmax.f32 %v137_v25, %v383_v27  ;;  %v511_v4 = vmax.f32 %v259_v0, %v510_v1  ;;  %v274_v27 = vmax.f32 %v24_v20, %v26_v21 }
  0xf0   :  { %v385_v35 = vmax.f32 %v138_v29, %v384_v31  ;;  %v512_v7 = vmax.f32 %v260_v2, %v511_v4 }
  0xf2   :  { %v386_v39 = vmax.f32 %v139_v33, %v385_v35  ;;  %v513_v11 = vmax.f32 %v261_v6, %v512_v7  ;;  %v269_v33 = vld [vmem:[#allocation2 + $0x7b0] sm:$0xff]  ;;  %v270_v35 = vld [vmem:[#allocation2 + $0x7b8] sm:$0xff] }
  0xf4   :  { %v387_v43 = vmax.f32 %v140_v37, %v386_v39  ;;  %v514_v15 = vmax.f32 %v262_v8, %v513_v11  ;;  %v150_v39 = vld [vmem:[#allocation2 + $0x3f8] sm:$0xff] }
  0xf6   :  { %v388_v47 = vmax.f32 %v141_v41, %v387_v43  ;;  %v515_v18 = vmax.f32 %v263_v14, %v514_v15  ;;  %v151_v43 = vld [vmem:[#allocation2 + $0x400] sm:$0xff] }
  0xf7   :  { %v404_v49 = vmax.f32 %v149_v42, %v151_v43 }
  0xf8   :  { %v389_v50 = vmax.f32 %v142_v45, %v388_v47  ;;  %v516_v23 = vmax.f32 %v264_v16, %v515_v18  ;;  %v403_v47 = vmax.f32 %v148_v38, %v150_v39 }
  0xfa   :  { %v390_v55 = vmax.f32 %v143_v51, %v389_v50  ;;  %v517_v25 = vmax.f32 %v265_v22, %v516_v23 }
  0xfc   :  { %v391_v61 = vmax.f32 %v144_v57, %v390_v55  ;;  %v518_v29 = vmax.f32 %v266_v24, %v517_v25 }
  0xfe   :  { %v392_v3 = vmax.f32 %v145_v63, %v391_v61  ;;  %v519_v31 = vmax.f32 %v267_v28, %v518_v29 }
 0x100   :  { %v393_v10 = vmax.f32 %v146_v5, %v392_v3  ;;  %v520_v34 = vmax.f32 %v268_v30, %v519_v31 }
 0x102   :  { %v394_v17 = vmax.f32 %v147_v13, %v393_v10  ;;  %v521_v36 = vmax.f32 %v269_v33, %v520_v34 }
 0x104   :  { %v395_v26 = vmax.f32 %v273_v19, %v394_v17  ;;  %v522_v41 = vmax.f32 %v270_v35, %v521_v36 }
 0x106   :  { %v396_v32 = vmax.f32 %v395_v26, %v274_v27  ;;  %v523_v45 = vmax.f32 %v271_v40, %v522_v41 }
 0x108   :  { %v397_v37 = vrot.slane %v396_v32, 4  ;;  %v524_v48 = vmax.f32 %v272_v44, %v523_v45 }
 0x10a   :  { %v398_v46 = vmax.f32 %v396_v32, %v397_v37  ;;  %v525_v51 = vmax.f32 %v403_v47, %v524_v48 }
 0x10c   :  { %v399_v50 = vrot.slane %v398_v46, 2  ;;  %v526_v52 = vmax.f32 %v525_v51, %v404_v49 }
 0x10e   :  { %v400_v53 = vmax.f32 %v398_v46, %v399_v50  ;;  %v527_v54 = vrot.slane %v526_v52, 4 }
 0x110   :  { %v528_v55 = vmax.f32 %v526_v52, %v527_v54  ;;  %v401_v56 = vrot.slane %v400_v53, 1 }
 0x112   :  { %v529_v57 = vrot.slane %v528_v55, 2  ;;  %v402_v59 = vmax.f32 %v400_v53, %v401_v56 }
 0x114   :  { %v530_v58 = vmax.f32 %v528_v55, %v529_v57 }
 0x116   :  { %v531_v60 = vrot.slane %v530_v58, 1 }
 0x118   :  { %v532_v61 = vmax.f32 %v530_v58, %v531_v60 }
 0x11a   :  { %v536_v62 = vsel %vm535_vm0, %v532_v61, %v402_v59 }
 0x11b   :  { %538 = vst [vmem:[#allocation5] sm:$0x3] %v536_v62 }
 0x11c   :  { %591 = shalt.err (!%p588_p12)
}
 0x11d   :  { %s592_s24 = scalar_lea.hbm %s645_s1, 32 }
 0x11e   :  { %p593_p13 = scmp.ne.s32.totalorder %s645_s1, %s592_s24  ;;  %p596_p0 = scmp.lt.u32.totalorder %s592_s24, %s645_s1 }
 0x120   :  { %p598_p1 = pnand %p596_p0, %p593_p13 }
 0x122   :  { %601 = shalt.err (!%p598_p1)
}
 0x123   :  { %548 = dma.vmem_to_hbm [thread:$0]  %s546_s20, 32, %s645_s1, [#allocation4]  }
 0x124   :  { %604 = dma.done.wait [#allocation4], 32  }
 0x125   :  { %605 = vsyncadd [#allocation4], 4294967264 }
 0x126   :  { %552 = vsyncpa [#allocation3], 1 }
 0x127   :  { %553 = vsyncpa [#allocation4], 1 }

</bundles_post_ra>
